<compile_context>
chip_gen: v7x
topology: tpu7x:2x2x1
jax: 0.10.0
libtpu: 0.0.40
codegen_flags: <defaults>
</compile_context>

<pallas_src>
import functools

import jax
import jax.numpy as jnp
from jax.experimental import pallas as pl
from jax.experimental.pallas import tpu as pltpu


@functools.lru_cache(maxsize=None)
def _vmem_capacity_bytes():
    """Physical VMEM per TensorCore; conservative fallback if the query is unavailable."""
    try:
        return int(pltpu.get_tpu_info().vmem_capacity_bytes)
    except Exception:  # pragma: no cover - defensive
        return 64 << 20  # v7x per-core capacity = smallest across v5e/v6e/v7x


def _make_seg_head_kernel(num_features, channels, use_staging):
    """Kernel for one (pixel-tile, image) grid point.

    refs layout:
      x_0..x_{F-1} : (channels, tp)   feature tiles (channel-major, pixels on lanes)
      w1           : (C, Cin)         fuse conv weight (streaming dtype)
      w2           : (K, C)           predict conv weight with BN scale folded in
      b2           : (K, 1)           predict conv bias with BN shift folded in (f32)
      out          : (K, tp)          lane-dense output tile (streaming dtype)
      xcat (scratch, optional): (Cin, tp) staging buffer for the fused contraction
    """

    def kernel(*refs):
        x_refs = refs[:num_features]
        w1_ref, w2_ref, b2_ref, out_ref = refs[num_features:num_features + 4]

        if use_staging:
            # Stage the F feature tiles into one contiguous [Cin, tp] buffer and issue a
            # single MXU dot with contraction Cin (accumulation stays inside the MXU).
            xcat_ref = refs[num_features + 4]
            for f in range(num_features):
                xcat_ref[f * channels:(f + 1) * channels, :] = x_refs[f][...]
            h = jnp.dot(w1_ref[...], xcat_ref[...],
                        preferred_element_type=jnp.float32)
        elif num_features == 1:
            h = jnp.dot(w1_ref[...], x_refs[0][...],
                        preferred_element_type=jnp.float32)
        else:
            # Fallback (only when channel blocks don't land on packed-word boundaries):
            # per-feature dots accumulated in f32.
            w1 = w1_ref[...]
            h = jnp.dot(w1[:, :channels], x_refs[0][...],
                        preferred_element_type=jnp.float32)
            for f in range(1, num_features):
                h = h + jnp.dot(w1[:, f * channels:(f + 1) * channels], x_refs[f][...],
                                preferred_element_type=jnp.float32)

        # ReLU; BatchNorm is folded into w2/b2.  Cast to the streaming dtype so the
        # predict matmul is a single-pass bf16 MXU op and the live footprint is halved.
        h = jnp.maximum(h, 0.0).astype(w2_ref.dtype)

        # Predict 1x1 conv, lane-dense (K, tp) output; bias added in f32.
        y = jnp.dot(w2_ref[...], h, preferred_element_type=jnp.float32) + b2_ref[...]
        out_ref[...] = y.astype(out_ref.dtype)

    return kernel


def _pick_tp(hw, budget_pixels, tp_cap):
    """Pixel-tile size: multiple of 128 within the VMEM budget, never above tp_cap.

    If the whole spatial extent fits the budget, use a single full-extent block
    (always layout-legal).  Otherwise use cdiv tiling; Pallas masks the trailing tile.
    """
    tp = min(budget_pixels, tp_cap)
    tp = max((tp // 128) * 128, 128)
    if hw <= tp:
        return hw
    return tp


@functools.partial(jax.jit, static_argnames=("tp_cap", "eps", "out_dtype"))
def segmentation_head_forward(xs, w_fuse, bn_gamma, bn_beta, bn_mean, bn_var,
                              w_pred, b_pred, *, tp_cap=8192, eps=1e-5, out_dtype=None):
    """xs: tuple of NCHW tensors [B, channels, H, W] (num_features of them).

    Activations / fuse weights may be bf16 (recommended) or f32; all matmuls accumulate
    in f32.  Output is NCHW [B, num_classes, H, W] in `out_dtype` (defaults to the
    activation dtype).
    """
    num_features = len(xs)
    B, channels, H, W = xs[0].shape
    HW = H * W
    C = w_fuse.shape[0]                 # fuse output channels (== channels)
    Cin = w_fuse.shape[1]               # channels * num_features
    K = w_pred.shape[0]                 # num_classes
    assert Cin == channels * num_features

    x_dtype = xs[0].dtype
    if out_dtype is None:
        out_dtype = x_dtype             # bf16 logits when activations are bf16
    x_isz = jnp.dtype(x_dtype).itemsize
    out_isz = jnp.dtype(out_dtype).itemsize

    # Staged single-dot fuse path requires each feature's channel block to land on
    # packed-word (sublane packing) boundaries of the scratch; otherwise fall back.
    packing = max(1, 4 // x_isz)
    use_staging = (num_features > 1) and (channels % packing == 0)

    # ---- Per-generation VMEM budget & pixel-tile sizing ----
    usable = (_vmem_capacity_bytes() * 3) // 4          # ~96 MiB v5e/v6e, ~48 MiB v7x
    # tp-independent residents: weights (default double-buffered) + bias.
    fixed = 2 * (C * Cin * x_isz + K * C * x_isz + K * 4)
    per_pixel = (2 * num_features * channels * x_isz    # x tiles, double-buffered
                 + 2 * K * out_isz                      # out tiles, double-buffered
                 + (Cin * x_isz if use_staging else 0)  # staging scratch
                 + C * (4 + x_isz))                     # live h (f32) + h cast
    budget_pixels = max((usable - fixed - (2 << 20)) // per_pixel, 128)
    tp = _pick_tp(HW, budget_pixels, tp_cap)
    nt = pl.cdiv(HW, tp)                                # trailing partial tile is masked
    vmem_limit = int(usable)

    # Free reshapes only (contiguous): keep NCHW, flatten spatial dims. No concat/transpose.
    x3 = [x.reshape(B, channels, HW) for x in xs]

    # Fold eval-mode BatchNorm (applied after ReLU, before predict) into the predict conv:
    #   y = W2 @ (relu(h)*scale + shift) + b = (W2*scale) @ relu(h) + (W2 @ shift + b)
    w_pred32 = w_pred.astype(jnp.float32)
    scale = bn_gamma.astype(jnp.float32) * jax.lax.rsqrt(bn_var.astype(jnp.float32) + eps)
    shift = bn_beta.astype(jnp.float32) - bn_mean.astype(jnp.float32) * scale
    w2 = (w_pred32 * scale[None, :]).astype(x_dtype)                       # [K, C]
    b2 = (w_pred32 @ shift + b_pred.astype(jnp.float32)).reshape(K, 1)     # [K, 1] f32

    # Fuse weight streamed in the activation dtype so the fuse matmul is single-pass MXU.
    w1 = w_fuse.astype(x_dtype)                                            # [C, Cin]

    # Pixel-tile axis first so megacore (v7x) splits the large axis even when B == 1.
    grid = (nt, B)

    in_specs = (
        [pl.BlockSpec((None, channels, tp), lambda j, b: (b, 0, j))] * num_features
        + [pl.BlockSpec((C, Cin), lambda j, b: (0, 0)),
           pl.BlockSpec((K, C), lambda j, b: (0, 0)),
           pl.BlockSpec((K, 1), lambda j, b: (0, 0))]
    )
    out_specs = pl.BlockSpec((None, K, tp), lambda j, b: (b, 0, j))
    scratch_shapes = [pltpu.VMEM((Cin, tp), x_dtype)] if use_staging else []

    out3 = pl.pallas_call(
        _make_seg_head_kernel(num_features, channels, use_staging),
        out_shape=jax.ShapeDtypeStruct((B, K, HW), out_dtype),
        grid_spec=pltpu.PrefetchScalarGridSpec(
            num_scalar_prefetch=0,
            grid=grid,
            in_specs=in_specs,
            out_specs=out_specs,
            scratch_shapes=scratch_shapes,
        ),
        compiler_params=pltpu.CompilerParams(
            dimension_semantics=("parallel", "parallel"),
            vmem_limit_bytes=vmem_limit,
        ),
    )(*x3, w1, w2, b2)

    return out3.reshape(B, K, H, W)     # free reshape; already NCHW


def _reference(xs, w_fuse, bn_gamma, bn_beta, bn_mean, bn_var, w_pred, b_pred, eps=1e-5):
    x = jnp.concatenate([x.astype(jnp.float32) for x in xs], axis=1)   # [B, Cin, H, W]
    h = jnp.einsum("bihw,oi->bohw", x, w_fuse.astype(jnp.float32))
    h = jnp.maximum(h, 0.0)
    scale = bn_gamma / jnp.sqrt(bn_var + eps)
    h = h * scale[None, :, None, None] + (bn_beta - bn_mean * scale)[None, :, None, None]
    y = jnp.einsum("bchw,oc->bohw", h, w_pred.astype(jnp.float32))
    return y + b_pred[None, :, None, None]


if __name__ == "__main__":
    # Small shapes: batch=2, channels=4, num_features=2, num_classes=3, spatial=16x16
    B, channels, num_features, num_classes, H, W = 2, 4, 2, 3, 16, 16
    Cin = channels * num_features

    key = jax.random.PRNGKey(0)
    k = jax.random.split(key, 8)

    # Streaming operands in bf16 (as they would arrive from an upstream backbone);
    # small per-channel parameters stay f32.
    xs = tuple(
        jax.random.normal(k[i], (B, channels, H, W), jnp.float32).astype(jnp.bfloat16)
        for i in range(num_features))
    w_fuse = (0.1 * jax.random.normal(k[2], (channels, Cin), jnp.float32)).astype(jnp.bfloat16)
    w_pred = 0.1 * jax.random.normal(k[3], (num_classes, channels), jnp.float32)
    b_pred = 0.05 * jax.random.normal(k[4], (num_classes,), jnp.float32)
    bn_gamma = 1.0 + 0.1 * jax.random.normal(k[5], (channels,), jnp.float32)
    bn_beta = 0.1 * jax.random.normal(k[6], (channels,), jnp.float32)
    bn_mean = 0.05 * jax.random.normal(k[7], (channels,), jnp.float32)
    bn_var = jnp.abs(1.0 + 0.1 * jax.random.normal(k[1], (channels,), jnp.float32))

    out = segmentation_head_forward(xs, w_fuse, bn_gamma, bn_beta, bn_mean,
                                    bn_var, w_pred, b_pred)
    out = jax.block_until_ready(out)

    ref = _reference(xs, w_fuse, bn_gamma, bn_beta, bn_mean, bn_var, w_pred, b_pred)
    assert out.shape == (B, num_classes, H, W), out.shape
    assert out.dtype == xs[0].dtype, out.dtype
    # Output (and the h / w2 intermediates) are bf16, so compare with bf16-level tolerance.
    ok = bool(jnp.allclose(out.astype(jnp.float32), ref, atol=1e-2, rtol=1e-2))
    assert ok, "mismatch vs reference"
    print("KERNEL_OK")
</pallas_src>

<mosaic_0001>
module attributes {stable_mosaic.version = 11 : i64} {
  func.func @kernel(%arg0: i32, %arg1: i32, %arg2: memref<1x4x256xbf16, #tpu.memory_space<vmem>>, %arg3: memref<1x4x256xbf16, #tpu.memory_space<vmem>>, %arg4: memref<4x8xbf16, #tpu.memory_space<vmem>>, %arg5: memref<3x4xbf16, #tpu.memory_space<vmem>>, %arg6: memref<3x1xf32, #tpu.memory_space<vmem>>, %arg7: memref<1x3x256xbf16, #tpu.memory_space<vmem>>, %arg8: memref<8x256xbf16, #tpu.memory_space<vmem>>) attributes {dimension_semantics = [#tpu.dimension_semantics<parallel>, #tpu.dimension_semantics<parallel>], iteration_bounds = array<i64: 1, 2>, scalar_prefetch = 0 : i64, scratch_operands = 1 : i64, tpu.core_type = #tpu.core_type<tc>, window_params = [{transform_indices = @transform_0, window_bounds = array<i64: 1, 4, 256>}, {transform_indices = @transform_1, window_bounds = array<i64: 1, 4, 256>}, {pipeline_mode = #tpu.pipeline_mode<synchronous>, transform_indices = @transform_2, window_bounds = array<i64: 4, 8>}, {pipeline_mode = #tpu.pipeline_mode<synchronous>, transform_indices = @transform_3, window_bounds = array<i64: 3, 4>}, {pipeline_mode = #tpu.pipeline_mode<synchronous>, transform_indices = @transform_4, window_bounds = array<i64: 3, 1>}, {transform_indices = @transform_5, window_bounds = array<i64: 1, 3, 256>}]} {
    %c0 = arith.constant 0 : index
    %c0_0 = arith.constant 0 : index
    %c0_1 = arith.constant 0 : index
    %0 = vector.load %arg2[%c0, %c0_0, %c0_1] : memref<1x4x256xbf16, #tpu.memory_space<vmem>>, vector<1x4x256xbf16>
    %1 = vector.shape_cast %0 : vector<1x4x256xbf16> to vector<4x256xbf16>
    %c0_2 = arith.constant 0 : index
    %c0_3 = arith.constant 0 : index
    %2 = vector.load %arg8[%c0_2, %c0_3] : memref<8x256xbf16, #tpu.memory_space<vmem>>, vector<4x256xbf16>
    tpu.vector_store %arg8[%c0_2, %c0_3], %1 {strides = array<i32>} : memref<8x256xbf16, #tpu.memory_space<vmem>>, vector<4x256xbf16>,
    %c0_4 = arith.constant 0 : index
    %c0_5 = arith.constant 0 : index
    %c0_6 = arith.constant 0 : index
    %3 = vector.load %arg3[%c0_4, %c0_5, %c0_6] : memref<1x4x256xbf16, #tpu.memory_space<vmem>>, vector<1x4x256xbf16>
    %4 = vector.shape_cast %3 : vector<1x4x256xbf16> to vector<4x256xbf16>
    %c4 = arith.constant 4 : index
    %c0_7 = arith.constant 0 : index
    %5 = vector.load %arg8[%c4, %c0_7] : memref<8x256xbf16, #tpu.memory_space<vmem>>, vector<4x256xbf16>
    tpu.vector_store %arg8[%c4, %c0_7], %4 {strides = array<i32>} : memref<8x256xbf16, #tpu.memory_space<vmem>>, vector<4x256xbf16>,
    %c0_8 = arith.constant 0 : index
    %c0_9 = arith.constant 0 : index
    %6 = vector.load %arg4[%c0_8, %c0_9] : memref<4x8xbf16, #tpu.memory_space<vmem>>, vector<4x8xbf16>
    %c0_10 = arith.constant 0 : index
    %c0_11 = arith.constant 0 : index
    %7 = vector.load %arg8[%c0_10, %c0_11] : memref<8x256xbf16, #tpu.memory_space<vmem>>, vector<8x256xbf16>
    %cst = arith.constant dense<0.000000e+00> : vector<4x256xf32>
    %8 = tpu.matmul %6, %7, %cst {dimension_numbers = #tpu.dot_dimension_numbers<[1], [0], [0], [1], [0, 0, 1, 1], [], []>} : vector<4x8xbf16>, vector<8x256xbf16>, vector<4x256xf32> -> vector<4x256xf32>
    %cst_12 = arith.constant 0.000000e+00 : f32
    %9 = vector.broadcast %cst_12 : f32 to vector<4x256xf32>
    %10 = arith.maximumf %8, %9 : vector<4x256xf32>
    %11 = arith.truncf %10 : vector<4x256xf32> to vector<4x256xbf16>
    %c0_13 = arith.constant 0 : index
    %c0_14 = arith.constant 0 : index
    %12 = vector.load %arg5[%c0_13, %c0_14] : memref<3x4xbf16, #tpu.memory_space<vmem>>, vector<3x4xbf16>
    %cst_15 = arith.constant dense<0.000000e+00> : vector<3x256xf32>
    %13 = tpu.matmul %12, %11, %cst_15 {dimension_numbers = #tpu.dot_dimension_numbers<[1], [0], [0], [1], [0, 0, 1, 1], [], []>} : vector<3x4xbf16>, vector<4x256xbf16>, vector<3x256xf32> -> vector<3x256xf32>
    %c0_16 = arith.constant 0 : index
    %c0_17 = arith.constant 0 : index
    %14 = vector.load %arg6[%c0_16, %c0_17] : memref<3x1xf32, #tpu.memory_space<vmem>>, vector<3x1xf32>
    %15 = vector.broadcast %14 : vector<3x1xf32> to vector<3x256xf32>
    %16 = arith.addf %13, %15 : vector<3x256xf32>
    %17 = arith.truncf %16 : vector<3x256xf32> to vector<3x256xbf16>
    %c0_18 = arith.constant 0 : index
    %c0_19 = arith.constant 0 : index
    %c0_20 = arith.constant 0 : index
    %18 = vector.load %arg7[%c0_18, %c0_19, %c0_20] : memref<1x3x256xbf16, #tpu.memory_space<vmem>>, vector<1x3x256xbf16>
    %19 = vector.shape_cast %18 : vector<1x3x256xbf16> to vector<3x256xbf16>
    %20 = vector.shape_cast %17 : vector<3x256xbf16> to vector<1x3x256xbf16>
    tpu.vector_store %arg7[%c0_18, %c0_19, %c0_20], %20 {strides = array<i32>} : memref<1x3x256xbf16, #tpu.memory_space<vmem>>, vector<1x3x256xbf16>,
    return
  }
  func.func @transform_0(%arg0: i32, %arg1: i32) -> (i32, i32, i32) {
    %c0_i32 = arith.constant 0 : i32
    %c0_i32_0 = arith.constant 0 : i32
    return %arg1, %c0_i32, %arg0 : i32, i32, i32
  }
  func.func @transform_1(%arg0: i32, %arg1: i32) -> (i32, i32, i32) {
    %c0_i32 = arith.constant 0 : i32
    %c0_i32_0 = arith.constant 0 : i32
    return %arg1, %c0_i32, %arg0 : i32, i32, i32
  }
  func.func @transform_2(%arg0: i32, %arg1: i32) -> (i32, i32) {
    %c0_i32 = arith.constant 0 : i32
    %c0_i32_0 = arith.constant 0 : i32
    %c0_i32_1 = arith.constant 0 : i32
    return %c0_i32, %c0_i32_0 : i32, i32
  }
  func.func @transform_3(%arg0: i32, %arg1: i32) -> (i32, i32) {
    %c0_i32 = arith.constant 0 : i32
    %c0_i32_0 = arith.constant 0 : i32
    %c0_i32_1 = arith.constant 0 : i32
    return %c0_i32, %c0_i32_0 : i32, i32
  }
  func.func @transform_4(%arg0: i32, %arg1: i32) -> (i32, i32) {
    %c0_i32 = arith.constant 0 : i32
    %c0_i32_0 = arith.constant 0 : i32
    %c0_i32_1 = arith.constant 0 : i32
    return %c0_i32, %c0_i32_0 : i32, i32
  }
  func.func @transform_5(%arg0: i32, %arg1: i32) -> (i32, i32, i32) {
    %c0_i32 = arith.constant 0 : i32
    %c0_i32_0 = arith.constant 0 : i32
    return %arg1, %c0_i32, %arg0 : i32, i32, i32
  }
}

</mosaic_0001>

<bundles_post_ra>
// kernel: segmentation_head_forward.1
= control target key start
LH: loop header
LB: loop body
LE: loop exit
PB: predicated region body
PF: predicated region fallthrough
CT: control target
= control target key end

     0   :  { %s685_s18 = smov 0   ;;  %s687_s19 = smov 0   ;;  %s738_s0 = inlined_call_operand.vmem [shape: bf16[2,4,256], index: 0, kind: input, shape index: {}]   ;;  %s739_s1 = inlined_call_operand.vmem [shape: bf16[2,4,256], index: 1, kind: input, shape index: {}]   ;;  %s740_s2 = inlined_call_operand.vmem [shape: bf16[4,8], index: 2, kind: input, shape index: {}]   ;;  %s741_s3 = inlined_call_operand.vmem [shape: bf16[3,4], index: 3, kind: input, shape index: {}]   ;;  %s742_s4 = inlined_call_operand.vmem [shape: f32[3,1], index: 4, kind: input, shape index: {}]   ;;  %s743_s5 = inlined_call_operand.vmem [shape: bf16[2,3,256], index: 5, kind: output, shape index: {}]  }
   0x1   :  { %s689_s20 = smov 0  }
   0x2 LB: > { %s24_s21 = sadd.s32 1, %s647_s19  ;;  %p578_p0 = scmp.ge.s32.totalorder %s651_s20, 1  ;;  %s651_s20 = sphi %s689_s20, %s15_s20   ;;  %s647_s19 = sphi %s687_s19, %s745_s19   ;;  %s643_s18 = sphi %s685_s18, %s744_s18  }
   0x3   : > { %p25_p1 = scmp.ge.s32.totalorder %s24_s21, 2  ;;  %p225_p2 = scmp.lt.s32.totalorder %s651_s20, 3 }
   0x5   : > { %s747_s21 = smov (%p25_p1, %s24_s21), 0  ;;  %p226_p3 = pnand %p578_p0, %p225_p2 }
   0x6   : > { %p271_p4 = scmp.lt.s32.totalorder (!%p226_p3), %s643_s18, 1  ;;  %v653_v0 = vmov (!%p226_p3), 0   ;;  %vm335_vm0 = vcmask (!%p226_p3), 1043456   ;;  %v324_v7 = vld [vmem:[%s740_s2] sm:$0x3] (!%p226_p3)  ;;  %vm331_vm1 = vcmask (!%p226_p3), 64512   ;;  %v454_v21 = vlaneseq (!%p226_p3) }
   0x7   : > { %229 = sbr.rel (%p226_p3) target bundleno = 475 (0x1db), region = 40  ;;  %374 = vmatprep.mubr.bf16.mxu0 (!%p226_p3), %v653_v0  ;;  %437 = vmatprep.mubr.bf16.mxu1 (!%p226_p3), %v653_v0  ;;  %v388_v8 = vld [vmem:[%s742_s4] sm:$0x7] (!%p226_p3)  ;;  %vm398_vm2 = vcmask (!%p226_p3), 1041408   ;;  %vm394_vm3 = vcmask (!%p226_p3), 31744   ;;  %vm462_vm5 = vcmask (!%p226_p3), 1043458  }
   0x8   : > { %625 = vset.pattern.permute.xlu0 (!%p226_p3), %v653_v0  ;;  %v387_v18 = vld [vmem:[%s741_s3] sm:$0x3] (!%p226_p3)  ;;  %v654_v19 = vmov (!%p226_p3), 1983009808   ;;  %vm460_vm4 = vsmask.f32 (!%p226_p3), 1280 }
   0x9   : > { %391 = vperm.xlu0 (!%p226_p3), %625, %v388_v8   ;;  %v452_v20 = vunpack.c.l.s4 (!%p226_p3), %v654_v19  ;;  %v455_v24 = vshrl.u32 (!%p226_p3), %v454_v21, 7  ;;  %vm463_vm6 = vsmask.f32 (!%p226_p3), 3328  ;;  %vm461_vm7 = vmand (!%p226_p3), %vm398_vm2, %vm460_vm4 }
   0xa   : > { %vm464_vm8 = vmand (!%p226_p3), %vm462_vm5, %vm463_vm6 }
   0xb   : > { %v453_v23 = vunpack.c.0.s8 (!%p226_p3), %v452_v20  ;;  %vm465_vm9 = vmor (!%p226_p3), %vm464_vm8, %vm461_vm7 }
   0xd   : > { %v456_v29 = vsub.s32 (!%p226_p3), %v453_v23, %v455_v24 }
   0xe   : > { %s749_s18 = smov (!%p271_p4, %s643_s18), 1 }
   0xf   : > { %s703_s22 = sshll.u32 %s749_s18, 2 }
  0x10   : > { %s278_s25 = scalar_lea.vmem %s738_s0, %s703_s22  ;;  %s288_s28 = scalar_lea.vmem %s739_s1, %s703_s22 }
  0x11   : > { %v585_v1 = vld.sshfl [vmem:[%s278_s25] sm:$0x33 pattern:$0x76325410]  ;;  %s298_s12 = scalar_lea.vmem %s743_s5, %s703_s22 }
  0x12   : > { %311 = vst [vmem:[#allocation2] sm:$0x33] %v585_v1  ;;  %v626_v2 = vld [vmem:[%s288_s28] ss:$0 sps:$4 sm:$0xff]  }
  0x13   : > { %586 = vst.sshfl [vmem:[#allocation2] sm:$0xf0 pattern:$0x76325410] %v626_v2  ;;  %v466_v33 = vld [vmem:[%s298_s12] sm:$0xf] }
  0x1a   : > { %v325_v3 = vld [vmem:[#allocation2] sm:$0xff] }
  0x1b   : > { %v588_v4 = vcombine.high %v325_v3, %v325_v3  ;;  %v587_v5 = vcombine.low %v325_v3, %v325_v3 }
  0x1d   : > { %589 = vmatprep.subr.msk.bf16.mxu0 %vm335_vm0, %v588_v4  ;;  %v337_v6 = vsel %vm335_vm0, %v587_v5, 0 }
  0x1e   : > { %343 = vmatpush1.bf16.msra.mxu0 %v337_v6 }
  0x21   : > { %590 = vmatmul.mubr.msk.bf16.vlgmr.msra.gmra.mrb[0].mxu0 %vm331_vm1, %v324_v7 }
  0x88   : > { %v392_v22 = vpop.permute.xlu0 %391 }
  0xf4   : > { %v376_v9 = vpop.f32.mrb[0].mxu0 }
  0xf5   : > { %v383_v10 = vmax.f32 %v376_v9, 0.0  ;;  %v378_v11 = vpop.f32.mrb[1].mxu0 }
  0xf6   : > { %v384_v12 = vmax.f32 %v378_v11, 0.0  ;;  %v380_v13 = vpop.f32.mrb[2].mxu0 }
  0xf7   : > { %v385_v14 = vpack.c.bf16 %v383_v10, %v383_v10  ;;  %v381_v15 = vpop.f32.mrb[3].mxu0 }
  0xf8   : > { %v386_v16 = vpack.c.bf16 %v384_v12, %v384_v12 }
  0xf9   : > { %v400_v17 = vsel %vm398_vm2, %v385_v14, 0 }
  0xfa   : > { %591 = vmatprep.subr.msk.bf16.mxu1 %vm398_vm2, %v386_v16 }
  0xfb   : > { %406 = vmatpush1.bf16.msra.mxu1 %v400_v17 }
  0xfe   : > { %592 = vmatmul.mubr.msk.bf16.vlgmr.msra.gmra.mrb[0].mxu1 %vm394_vm3, %v387_v18 }
 0x1d1   : > { %v439_v25 = vpop.f32.mrb[0].mxu1 }
 0x1d2   : > { %v440_v26 = vadd.f32 %v439_v25, %v392_v22  ;;  %v441_v27 = vpop.f32.mrb[1].mxu1 }
 0x1d3   : > { %v442_v28 = vadd.f32 %v441_v27, %v392_v22  ;;  %v443_v30 = vpop.f32.mrb[2].mxu1 }
 0x1d4   : > { %v444_v31 = vpop.f32.mrb[3].mxu1 }
 0x1d5   : > { %v593_v32 = vpack.c.bf16 %v442_v28, %v440_v26 }
 0x1d7   : > { %v457_v34 = vrot.slane %v593_v32, %v456_v29 }
 0x1d9   : > { %v467_v35 = vsel %vm465_vm9, %v457_v34, %v466_v33 }
 0x1da   : > { %468 = vst [vmem:[%s298_s12] sm:$0xf] %v467_v35 }
 0x1db PF: > { %s15_s20 = sadd.s32 1, %s651_s20   ;;  %s744_s18 = smov %s647_s19 }
 0x1dc   : > { %p12_p5 = scmp.ge.s32.totalorder %s15_s20, 4   ;;  %s745_s19 = smov %s747_s21 }
 0x1de   :  { %14 = sbr.rel (!%p12_p5) target bundleno = 2 (0x2), region = 73 }

</bundles_post_ra>
